<compile_context>
chip_gen: v7x
topology: tpu7x:2x2x1
jax: 0.10.0
libtpu: 0.0.40
codegen_flags: <defaults>
</compile_context>

<pallas_src>
import math

import jax
import jax.numpy as jnp
import numpy as np
from jax.scipy.linalg import solve_triangular
from jax.experimental import pallas as pl
from jax.experimental.pallas import tpu as pltpu


def _gm_kernel(x_ref, a_ref, t_ref, c_ref, out_ref):
    # x_ref:   (TN, F)          f32 tile of flattened samples
    # a_ref:   (3F, Fp*G)       bf16 stacked whitening matrix [A_hi; A_hi; A_lo],
    #                           A[i, j*G+g] = (L_g^{-1})[j, i]   (feature-major interleave)
    # t_ref:   (1, Fp*G)        f32, t[j*G+g] = (L_g^{-1} mu_g)_j
    # c_ref:   (1, G)           f32, c[g] = -0.5*(F*log(2pi) + logdet C_g)
    # out_ref: (TN, G)          likelihoods
    num_g = out_ref.shape[-1]
    lanes = a_ref.shape[-1]

    x = x_ref[...].astype(jnp.float32)

    # Manual bf16 hi/lo split of x; the three bf16x3 product terms are fused into a
    # single one-pass MXU matmul by stacking them along K (K = 3F).
    x_hi = x.astype(jnp.bfloat16)
    x_lo = (x - x_hi.astype(jnp.float32)).astype(jnp.bfloat16)
    x_wide = jnp.concatenate([x_hi, x_lo, x_hi], axis=-1)            # (TN, 3F) bf16

    z = jnp.dot(x_wide, a_ref[...],
                preferred_element_type=jnp.float32)                  # (TN, Fp*G) f32

    d = z - t_ref[...]            # (L_g^{-1}(x - mu_g))_j  at lane j*G + g
    p = d * d                                                        # VPU

    # Segmented sum over the F (padded to Fp) entries of each gaussian, which sit
    # at stride-G lanes.  log2(Fp) XLU roll + VPU add steps; because the circular
    # sum covers the full residue class {g, g+G, ...} exactly once, lane g ends up
    # holding maha[n, g] regardless of roll direction.
    shift = num_g
    while shift < lanes:
        p = p + pltpu.roll(p, shift=shift, axis=1)
        shift *= 2

    maha = p[:, :num_g]                                              # (TN, G)
    out_ref[...] = jnp.exp(-0.5 * maha + c_ref[...]).astype(out_ref.dtype)


def _round_up(value, multiple):
    return ((value + multiple - 1) // multiple) * multiple


def gm_layer_forward(x, centers, covariance, *, tile_n=4096):
    """Pallas GMLayer forward. x: (B, S, F) -> (B, S, G)."""
    B, S, F = x.shape
    G = centers.shape[0]
    N = B * S

    centers = centers.astype(jnp.float32)
    covariance = covariance.astype(jnp.float32)

    # ---- Parameter preprocessing (plain JAX; one Cholesky gives both the
    #      inverse-apply and the log-determinant). ----
    # TODO(synk): assumes symmetric positive-definite covariance (as the Gaussian
    # mixture requires); the (G,F,F) factorization itself has no Pallas primitive
    # and stays in XLA.
    cov_sym = 0.5 * (covariance + jnp.swapaxes(covariance, -1, -2))
    chol = jnp.linalg.cholesky(cov_sym)                                   # (G,F,F) lower
    logdet = 2.0 * jnp.sum(jnp.log(jnp.diagonal(chol, axis1=-2, axis2=-1)), axis=-1)
    eye = jnp.eye(F, dtype=jnp.float32)
    linv = jax.vmap(lambda m: solve_triangular(m, eye, lower=True))(chol)  # (G,F,F)

    # Feature-major interleaved whitening matrix: A[i, j*G+g] = linv[g, j, i]
    # so (x @ A)[n, j*G+g] = (L_g^{-1} x_n)_j, and the in-kernel stride-G reduction
    # drops maha_g directly onto lane g.  Pad F to a power of two with zero columns
    # so the doubling reduction is exact for any F.
    f_pad = max(1, 1 << (F - 1).bit_length())
    a3 = jnp.transpose(linv, (2, 1, 0))                                   # (F_i, F_j, G)
    t2 = jnp.einsum('gji,gi->jg', linv, centers)                          # (F_j, G)
    if f_pad != F:
        a3 = jnp.pad(a3, ((0, 0), (0, f_pad - F), (0, 0)))
        t2 = jnp.pad(t2, ((0, f_pad - F), (0, 0)))
    a_mat = a3.reshape(F, f_pad * G)
    t_row = t2.reshape(1, f_pad * G).astype(jnp.float32)

    # bf16 hi/lo split of A, stacked along K so one MXU pass gives ~bf16x3 accuracy:
    #   z = x_hi@A_hi + x_lo@A_hi + x_hi@A_lo
    a_hi = a_mat.astype(jnp.bfloat16)
    a_lo = (a_mat - a_hi.astype(jnp.float32)).astype(jnp.bfloat16)
    a_stack = jnp.concatenate([a_hi, a_hi, a_lo], axis=0)                 # (3F, f_pad*G)

    c_row = (-0.5 * (F * math.log(2.0 * math.pi) + logdet)).reshape(1, G).astype(jnp.float32)

    # ---- Tiling over N = B*S (padded ragged tail, VMEM-safe, megacore-friendly) ----
    lanes = f_pad * G
    # VMEM guard: the live (tile_n, lanes) f32 intermediates dominate the footprint;
    # keep each around <= 1 MiB so even v7x's smaller VMEM has ample headroom.
    vmem_rows = max(8, ((1 << 20) // max(1, lanes)) // 8 * 8)
    tile_n = max(8, min(_round_up(tile_n, 8), vmem_rows, _round_up(N, 8)))
    if N > 8:
        # >= 2 grid steps whenever possible so the "parallel" row axis can be
        # sharded across both TensorCores on v7x.
        tile_n = min(tile_n, _round_up(pl.cdiv(N, 2), 8))
    n_pad = _round_up(N, tile_n)

    x_flat = x.reshape(N, F).astype(jnp.float32)
    if n_pad != N:
        x_flat = jnp.pad(x_flat, ((0, n_pad - N), (0, 0)))

    out_flat = pl.pallas_call(
        _gm_kernel,
        out_shape=jax.ShapeDtypeStruct((n_pad, G), x.dtype),
        grid_spec=pltpu.PrefetchScalarGridSpec(
            num_scalar_prefetch=0,
            grid=(n_pad // tile_n,),
            in_specs=[
                pl.BlockSpec((tile_n, F), lambda i: (i, 0)),          # x tile
                pl.BlockSpec((3 * F, lanes), lambda i: (0, 0)),       # A stack (resident)
                pl.BlockSpec((1, lanes), lambda i: (0, 0)),           # t       (resident)
                pl.BlockSpec((1, G), lambda i: (0, 0)),               # c       (resident)
            ],
            out_specs=pl.BlockSpec((tile_n, G), lambda i: (i, 0)),
        ),
        compiler_params=pltpu.CompilerParams(
            dimension_semantics=("parallel",)),
    )(x_flat, a_stack, t_row, c_row)

    return out_flat[:N].reshape(B, S, G)


def gm_layer_reference_f64(x, centers, covariance):
    """float64 numpy ground truth of compute_likelihoods."""
    x = np.asarray(x, np.float64)
    mu = np.asarray(centers, np.float64)
    cov = np.asarray(covariance, np.float64)
    F = mu.shape[1]
    cov_inv = np.linalg.inv(cov)
    det_cov = np.linalg.det(cov)
    diff = x[:, :, None, :] - mu[None, None, :, :]                    # (B, S, G, F)
    maha = np.einsum('bsgi,gij,bsgj->bsg', diff, cov_inv, diff)
    norm = np.log((2.0 * np.pi) ** F * det_cov)                       # (G,)
    return np.exp(-0.5 * (maha + norm[None, None, :]))


if __name__ == "__main__":
    # Shapes consistent with the module's forward:
    #   bags B=2, samples per bag S=8, n_features F=16, num_gaussians G=8.
    B, S, F, G = 2, 8, 16, 8

    key = jax.random.PRNGKey(0)
    kx, kc, kr = jax.random.split(key, 3)

    x = jax.random.uniform(kx, (B, S, F), dtype=jnp.float32)
    # Parameter init mirroring __init__: centers ~ U[0,1), covariance = eye(F) per gaussian.
    centers = jax.random.uniform(kc, (G, F), dtype=jnp.float32)
    covariance = jnp.tile(jnp.eye(F, dtype=jnp.float32)[None, :, :], (G, 1, 1))

    out = jax.block_until_ready(gm_layer_forward(x, centers, covariance))
    assert out.shape == (B, S, G), out.shape
    ref = gm_layer_reference_f64(x, centers, covariance)
    np.testing.assert_allclose(np.asarray(out), ref, rtol=1e-3, atol=1e-20)

    # Second check: non-identity SPD covariance and a ragged N (exercises padding
    # and the >=2-step parallel grid path).
    B2, S2 = 3, 5
    x2 = jax.random.uniform(jax.random.fold_in(kx, 1), (B2, S2, F), dtype=jnp.float32)
    r = jax.random.normal(kr, (G, F, F), dtype=jnp.float32)
    cov2 = (jnp.eye(F, dtype=jnp.float32)[None, :, :]
            + 0.1 * jnp.einsum('gik,gjk->gij', r, r) / F)
    out2 = jax.block_until_ready(gm_layer_forward(x2, centers, cov2))
    assert out2.shape == (B2, S2, G), out2.shape
    ref2 = gm_layer_reference_f64(x2, centers, cov2)
    np.testing.assert_allclose(np.asarray(out2), ref2, rtol=1e-3, atol=1e-20)

    print("KERNEL_OK")
</pallas_src>

<mosaic_0001>
module attributes {stable_mosaic.version = 11 : i64} {
  func.func @_gm_kernel(%arg0: i32, %arg1: memref<8x16xf32, #tpu.memory_space<vmem>>, %arg2: memref<48x128xbf16, #tpu.memory_space<vmem>>, %arg3: memref<1x128xf32, #tpu.memory_space<vmem>>, %arg4: memref<1x8xf32, #tpu.memory_space<vmem>>, %arg5: memref<8x8xf32, #tpu.memory_space<vmem>>) attributes {dimension_semantics = [#tpu.dimension_semantics<parallel>], iteration_bounds = array<i64: 2>, scalar_prefetch = 0 : i64, scratch_operands = 0 : i64, tpu.core_type = #tpu.core_type<tc>, window_params = [{transform_indices = @transform_0, window_bounds = array<i64: 8, 16>}, {pipeline_mode = #tpu.pipeline_mode<synchronous>, transform_indices = @transform_1, window_bounds = array<i64: 48, 128>}, {pipeline_mode = #tpu.pipeline_mode<synchronous>, transform_indices = @transform_2, window_bounds = array<i64: 1, 128>}, {pipeline_mode = #tpu.pipeline_mode<synchronous>, transform_indices = @transform_3, window_bounds = array<i64: 1, 8>}, {transform_indices = @transform_4, window_bounds = array<i64: 8, 8>}]} {
    %c0 = arith.constant 0 : index
    %c0_0 = arith.constant 0 : index
    %0 = vector.load %arg1[%c0, %c0_0] : memref<8x16xf32, #tpu.memory_space<vmem>>, vector<8x16xf32>
    %1 = arith.truncf %0 : vector<8x16xf32> to vector<8x16xbf16>
    %2 = arith.extf %1 : vector<8x16xbf16> to vector<8x16xf32>
    %3 = arith.subf %0, %2 : vector<8x16xf32>
    %4 = arith.truncf %3 : vector<8x16xf32> to vector<8x16xbf16>
    %5 = tpu.concatenate %1, %4, %1 in 1 : vector<8x16xbf16>, vector<8x16xbf16>, vector<8x16xbf16> -> vector<8x48xbf16>
    %c0_1 = arith.constant 0 : index
    %c0_2 = arith.constant 0 : index
    %6 = vector.load %arg2[%c0_1, %c0_2] : memref<48x128xbf16, #tpu.memory_space<vmem>>, vector<48x128xbf16>
    %cst = arith.constant dense<0.000000e+00> : vector<8x128xf32>
    %7 = tpu.matmul %5, %6, %cst {dimension_numbers = #tpu.dot_dimension_numbers<[1], [0], [0], [1], [0, 0, 1, 1], [], []>} : vector<8x48xbf16>, vector<48x128xbf16>, vector<8x128xf32> -> vector<8x128xf32>
    %c0_3 = arith.constant 0 : index
    %c0_4 = arith.constant 0 : index
    %8 = vector.load %arg3[%c0_3, %c0_4] : memref<1x128xf32, #tpu.memory_space<vmem>>, vector<1x128xf32>
    %9 = vector.broadcast %8 : vector<1x128xf32> to vector<8x128xf32>
    %10 = arith.subf %7, %9 : vector<8x128xf32>
    %11 = arith.mulf %10, %10 : vector<8x128xf32>
    %c8_i32 = arith.constant 8 : i32
    %12 = tpu.dynamic_rotate %11 by %c8_i32 dim 1 : vector<8x128xf32>, i32 -> vector<8x128xf32>
    %13 = arith.addf %11, %12 : vector<8x128xf32>
    %c16_i32 = arith.constant 16 : i32
    %14 = tpu.dynamic_rotate %13 by %c16_i32 dim 1 : vector<8x128xf32>, i32 -> vector<8x128xf32>
    %15 = arith.addf %13, %14 : vector<8x128xf32>
    %c32_i32 = arith.constant 32 : i32
    %16 = tpu.dynamic_rotate %15 by %c32_i32 dim 1 : vector<8x128xf32>, i32 -> vector<8x128xf32>
    %17 = arith.addf %15, %16 : vector<8x128xf32>
    %c64_i32 = arith.constant 64 : i32
    %18 = tpu.dynamic_rotate %17 by %c64_i32 dim 1 : vector<8x128xf32>, i32 -> vector<8x128xf32>
    %19 = arith.addf %17, %18 : vector<8x128xf32>
    %20 = vector.extract_strided_slice %19 {offsets = [0, 0], sizes = [8, 8], strides = [1, 1]} : vector<8x128xf32> to vector<8x8xf32>
    %cst_5 = arith.constant -5.000000e-01 : f32
    %21 = vector.broadcast %cst_5 : f32 to vector<8x8xf32>
    %22 = arith.mulf %21, %20 : vector<8x8xf32>
    %c0_6 = arith.constant 0 : index
    %c0_7 = arith.constant 0 : index
    %23 = vector.load %arg4[%c0_6, %c0_7] : memref<1x8xf32, #tpu.memory_space<vmem>>, vector<1x8xf32>
    %24 = vector.broadcast %23 : vector<1x8xf32> to vector<8x8xf32>
    %25 = arith.addf %22, %24 : vector<8x8xf32>
    %26 = math.exp %25 : vector<8x8xf32>
    %c0_8 = arith.constant 0 : index
    %c0_9 = arith.constant 0 : index
    %27 = vector.load %arg5[%c0_8, %c0_9] : memref<8x8xf32, #tpu.memory_space<vmem>>, vector<8x8xf32>
    tpu.vector_store %arg5[%c0_8, %c0_9], %26 {strides = array<i32>} : memref<8x8xf32, #tpu.memory_space<vmem>>, vector<8x8xf32>,
    return
  }
  func.func @transform_0(%arg0: i32) -> (i32, i32) {
    %c0_i32 = arith.constant 0 : i32
    %c0_i32_0 = arith.constant 0 : i32
    return %arg0, %c0_i32 : i32, i32
  }
  func.func @transform_1(%arg0: i32) -> (i32, i32) {
    %c0_i32 = arith.constant 0 : i32
    %c0_i32_0 = arith.constant 0 : i32
    %c0_i32_1 = arith.constant 0 : i32
    return %c0_i32, %c0_i32_0 : i32, i32
  }
  func.func @transform_2(%arg0: i32) -> (i32, i32) {
    %c0_i32 = arith.constant 0 : i32
    %c0_i32_0 = arith.constant 0 : i32
    %c0_i32_1 = arith.constant 0 : i32
    return %c0_i32, %c0_i32_0 : i32, i32
  }
  func.func @transform_3(%arg0: i32) -> (i32, i32) {
    %c0_i32 = arith.constant 0 : i32
    %c0_i32_0 = arith.constant 0 : i32
    %c0_i32_1 = arith.constant 0 : i32
    return %c0_i32, %c0_i32_0 : i32, i32
  }
  func.func @transform_4(%arg0: i32) -> (i32, i32) {
    %c0_i32 = arith.constant 0 : i32
    %c0_i32_0 = arith.constant 0 : i32
    return %arg0, %c0_i32 : i32, i32
  }
}

</mosaic_0001>

<bundles_post_ra>
// kernel: tpu_custom_call.1
= control target key start
LH: loop header
LB: loop body
LE: loop exit
PB: predicated region body
PF: predicated region fallthrough
CT: control target
= control target key end

     0   :  { %9 = vsyncpa [#allocation3], 0  ;;  %s796_s0 = inlined_call_operand.hbm [shape: f32[16,16], index: 0, kind: input, shape index: {}]   ;;  %s797_s1 = inlined_call_operand.hbm [shape: bf16[48,128], index: 1, kind: input, shape index: {}]   ;;  %s798_s2 = inlined_call_operand.vmem [shape: f32[1,128], index: 2, kind: input, shape index: {}]   ;;  %s799_s3 = inlined_call_operand.vmem [shape: f32[1,8], index: 3, kind: input, shape index: {}]   ;;  %s800_s4 = inlined_call_operand.vmem [shape: f32[16,8], index: 4, kind: output, shape index: {}]  }
   0x1   :  { %11 = vsyncpa [#allocation3 + $0x1], 0 }
   0x2   :  { %12 = vsyncpa [#allocation5], 0  ;;  %s651_s15 = smov 0   ;;  %s653_s16 = smov 0  }
   0x3   :  { %s655_s17 = smov 0   ;;  %s657_s18 = smov 0  }
   0x4 LB: > { %s670_s19 = sadd.s32 4294967295, %s614_s18   ;;  %p38_p0 = scmp.ne.s32.totalorder %s606_s16, %s602_s15  ;;  %s614_s18 = sphi %s657_s18, %s815_s18   ;;  %s610_s17 = sphi %s655_s17, %s814_s17   ;;  %s606_s16 = sphi %s653_s16, %s813_s16   ;;  %s602_s15 = sphi %s651_s15, %s812_s15  }
   0x5   : > { %p801_p1 = scmp.eq.s32.totalorder %s670_s19, 0  ;;  %p424_p2 = scmp.ge.s32.totalorder %s614_s18, 1 }
   0x6   : > { %p138_p3 = scmp.lt.s32.totalorder %s614_s18, 3  ;;  %s616_s22 = smov [#allocation4]  }
   0x7   : > { %p678_p4 = por %p801_p1, %p38_p0  ;;  %s150_s23 = sshll.u32 %s616_s22, 4  ;;  %s151_s23 = int_to_ptr.vmem [resolvable:$true] %s150_s23 }
   0x8   : > { %p682_p5 = pnand %p424_p2, %p138_p3  ;;  %s695_s25 = sadd.s32 1, %s614_s18  }
   0x9   : > { %s804_s20 = scalar_select %p678_p4, 1, 0 }
   0xa   : > { %s805_s21 = scalar_select %p682_p5, 1, 0 }
   0xb   : > { %p461_p6 = pneg %p682_p5  ;;  %s25_s26 = sadd.s32 1, %s610_s17 }
   0xc   : > { %s22_s27 = ssub.s32 %s614_s18, %s695_s25  ;;  %s518_s30 = scalar_lea.hbm %s797_s1, 384 }
   0xd   : > { %p690_p7 = pnand %p461_p6, %p801_p1  ;;  %p519_p8 = scmp.ne.s32.totalorder %s797_s1, %s518_s30 }
   0xe   : > { %p525_p12 = scmp.lt.u32.totalorder %s518_s30, %s797_s1 }
   0xf   : > { %p520_p9 = pneg %p690_p7 }
  0x11   : > { %p521_p10 = pnand %p520_p9, %p519_p8 }
  0x13   : > { %p522_p11 = pneg %p521_p10 }
  0x15   : > { %p527_p13 = pnand %p525_p12, %p522_p11 }
  0x17   : > { %530 = shalt.err (!%p527_p13)
}
  0x18   : > { %s531_s9 = scalar_lea.vmem %s151_s23, 384  ;;  %p539_p6 = scmp.lt.s32.totalorder %s151_s23, %s151_s23 }
  0x19   : > { %p532_p0 = scmp.ne.s32.totalorder %s151_s23, %s531_s9  ;;  %p540_p1 = scmp.lt.s32.totalorder %s531_s9, %s531_s9 }
  0x1b   : > { %p534_p2 = pnand %p532_p0, %p520_p9  ;;  %p541_p4 = por %p540_p1, %p539_p6 }
  0x1d   : > { %p535_p3 = pneg %p534_p2 }
  0x1f   : > { %p542_p5 = pnand %p541_p4, %p535_p3 }
  0x21   : > { %545 = shalt.err (!%p542_p5)
}
  0x22   : > { %s617_s10 = smov 64   ;;  %s618_s11 = smov 4  }
  0x23   : > { %464 = dma.hbm_to_vmem [thread:$0]  (!%p690_p7), %s797_s1, 384, %s151_s23, [#allocation5], %s617_s10, %s617_s10, %s618_s11  }
  0x24   : > { %p23_p8 = scmp.eq.s32.totalorder %s22_s27, 0  ;;  %p32_p9 = scmp.ne.s32.totalorder %s610_s17, %s606_s16 }
  0x25   : > { %p33_p1 = scmp.eq.s32.totalorder %s614_s18, 0  ;;  %p470_p4 = scmp.lt.s32.totalorder %s614_s18, 2 }
  0x26   : > { %s721_s14 = scalar_select %p23_p8, %s610_s17, %s25_s26  }
  0x27   : > { %p34_p5 = por %p33_p1, %p32_p9  ;;  %s170_s15 = sand.u32 1, %s610_s17  }
  0x28   : > { %s427_s22 = sshll.u32 %s170_s15, 3  ;;  %s428_s28 = sshll.u32 %s614_s18, 7 }
  0x29   : > { %s728_s5 = scalar_lea.hbm %s796_s0, %s428_s28  ;;  %s174_s23 = scalar_lea.vmem [#allocation2], %s427_s22 }
  0x2a   : > { %s181_s24 = sshll.u32 %s174_s23, 4  ;;  %p732_p7 = pnand %p470_p4, %p34_p5  ;;  %s730_s24 = int_to_ptr.vmem [resolvable:$true] %s181_s24 }
  0x2b   : > { %s171_s18 = scalar_lea.sflag [#allocation3], %s170_s15  ;;  %s546_s27 = scalar_lea.hbm %s728_s5, 128 }
  0x2c   : > { %p547_p10 = scmp.ne.s32.totalorder %s728_s5, %s546_s27  ;;  %p548_p11 = pneg %p732_p7 }
  0x2d   : > { %s551_s8 = scalar_lea.hbm %s796_s0, 256  ;;  %p552_p0 = scmp.lt.u32.totalorder %s728_s5, %s796_s0 }
  0x2e   : > { %p549_p12 = pnand %p548_p11, %p547_p10  ;;  %p553_p2 = scmp.lt.u32.totalorder %s551_s8, %s546_s27 }
  0x2f   : > { %p555_p6 = scmp.lt.u32.totalorder %s546_s27, %s728_s5 }
  0x30   : > { %p550_p13 = pneg %p549_p12  ;;  %p554_p3 = por %p553_p2, %p552_p0 }
  0x32   : > { %p556_p8 = por %p555_p6, %p554_p3 }
  0x34   : > { %p557_p9 = pnand %p556_p8, %p550_p13 }
  0x36   : > { %560 = shalt.err (!%p557_p9)
}
  0x37   : > { %s561_s11 = scalar_lea.vmem %s730_s24, 128  ;;  %s619_s12 = smov [#allocation2]  }
  0x38   : > { %p562_p1 = scmp.ne.s32.totalorder %s730_s24, %s561_s11  ;;  %s566_s13 = sshll.u32 %s619_s12, 4  ;;  %s567_s13 = int_to_ptr.vmem [resolvable:$false] %s566_s13 }
  0x39   : > { %s568_s15 = scalar_lea.vmem %s567_s13, 256  ;;  %p569_p10 = scmp.lt.s32.totalorder %s730_s24, %s567_s13 }
  0x3a   : > { %p564_p4 = pnand %p562_p1, %p548_p11  ;;  %p570_p12 = scmp.lt.s32.totalorder %s568_s15, %s561_s11 }
  0x3c   : > { %p565_p5 = pneg %p564_p4  ;;  %p571_p0 = por %p570_p12, %p569_p10 }
  0x3e   : > { %p572_p2 = pnand %p571_p0, %p565_p5 }
  0x40   : > { %575 = shalt.err (!%p572_p2)
}
  0x41   : > { %468 = dma.hbm_to_vmem [thread:$0]  (!%p732_p7), %s728_s5, 128, %s730_s24, %s171_s18  }
  0x42   : > { %p808_p13 = scmp.ne.s32.totalorder %s805_s21, 0 }
  0x43   : > { %s192_s22 = sand.u32 (!%p808_p13), 1, %s606_s16   ;;  %p809_p11 = scmp.ne.s32.totalorder (!%p808_p13), %s804_s20, 0 }
  0x44   : > { %190 = sbr.rel (%p808_p13) target bundleno = 910 (0x38e), region = 36  ;;  %s430_s28 = sshll.u32 (!%p808_p13), %s192_s22, 3 }
  0x45   : > { %s193_s29 = scalar_lea.sflag (!%p808_p13), [#allocation3], %s192_s22  ;;  %s196_s30 = scalar_lea.vmem (!%p808_p13), [#allocation2], %s430_s28 }
  0x4b   : > { %593 = dma.done.wait (%p809_p11), %s193_s29, 128  }
  0x4c   : > { %595 = vsyncadd (%p809_p11), %s193_s29, 4294967168  ;;  %p810_p3 = scmp.eq.s32.totalorder %s670_s19, 0 }
  0x4e   : > { %597 = dma.done.wait (%p810_p3), [#allocation5], 384   ;;  %p811_p6 = pmov %p810_p3 }
  0x4f   : > { %v620_v0 = vmov 0.0   ;;  %v229_v1 = vld [vmem:[%s196_s30] sm:$0xff]  ;;  %vm621_vm0 = vmmov 0   ;;  %v513_v3 = vld [vmem:[#allocation4] sm:$0xff]   ;;  %v514_v5 = vld [vmem:[#allocation4 + $0x8] sm:$0xff]   ;;  %s622_s20 = smov 16  }
  0x50   : > { %599 = vsyncadd (%p811_p6), [#allocation5], 4294966912  ;;  %445 = vmatprep.subr.bf16.mxu0 %v620_v0  ;;  %451 = vmatprep.mubr.msk.bf16.mxu0 %vm621_vm0, %v620_v0  ;;  %v230_v2 = vpack.c.bf16 %v229_v1, %v229_v1  ;;  %v515_v8 = vld [vmem:[#allocation4 + $0x10] sm:$0xff]   ;;  %s623_s21 = smov 32   ;;  %vm240_vm1 = vcmask 130048   ;;  %vm244_vm2 = vcmask 261120  }
  0x51   : > { %446 = vmatpush3.bf16.msra.mxu0 %v513_v3  ;;  %vm271_vm3 = vcmask 392192   ;;  %v437_v13 = vld [vmem:[%s798_s2] ss:$0 sm:$0xff]  ;;  %s624_s24 = smov 8   ;;  %s625_s26 = smov 64   ;;  %vm346_vm4 = vcmask 64512  }
  0x52   : > { %v231_v4 = vunpack.c.l.bf16 %v230_v2  ;;  %447 = vmatprep.subr.bf16.mxu0 %v620_v0  ;;  %v438_v28 = vld [vmem:[%s799_s3] ss:$0 sm:$0xff]  ;;  %p224_p7 = scmp.lt.s32.totalorder %s670_s19, 1 }
  0x54   : > { %v232_v6 = vsub.f32 %v229_v1, %v231_v4  ;;  %s817_s19 = smov (!%p224_p7, %s670_s19), 1 }
  0x55   : > { %448 = vmatpush3.bf16.msra.mxu0 %v514_v5  ;;  %s432_s6 = sshll.u32 %s817_s19, 3 }
  0x56   : > { %v233_v7 = vpack.c.bf16 %v232_v6, %v232_v6  ;;  %449 = vmatprep.subr.bf16.mxu0 %v620_v0  ;;  %s227_s9 = scalar_lea.vmem %s800_s4, %s432_s6 }
  0x58   : > { %235 = vrot.lane.b32.xlu0 %v233_v7, %s622_s20 }
  0x59   : > { %450 = vmatpush3.bf16.msra.mxu0 %v515_v8 }
  0x5c   : > { %238 = vrot.lane.b32.xlu0 %v230_v2, %s623_s21 }
  0xca   : > { %v236_v9 = vpop.permute.xlu0 %235 }
  0xcb   : > { %v243_v10 = vsel %vm240_vm1, %v230_v2, %v236_v9 }
  0xce   : > { %v239_v11 = vpop.permute.xlu0 %238 }
  0xcf   : > { %v246_v12 = vsel %vm244_vm2, %v243_v10, %v239_v11 }
  0xd0   : > { %452 = vmatmul.mubr.msk.bf16.vlgmr.msra.gmra.mrb[0].mxu0 %vm271_vm3, %v246_v12 }
 0x1a3   : > { %v308_v14 = vpop.f32.mrb[0].mxu0 }
 0x1a4   : > { %v321_v15 = vsub.f32 %v308_v14, %v437_v13  ;;  %v453_v16 = vpop.f32.mrb[1].mxu0 }
 0x1a5   : > { %v311_v17 = vpop.f32.mrb[2].mxu0 }
 0x1a6   : > { %v322_v18 = vmul.f32 %v321_v15, %v321_v15  ;;  %v454_v19 = vpop.f32.mrb[3].mxu0 }
 0x1a8   : > { %323 = vrot.lane.b32.xlu1 %v322_v18, %s624_s24 }
 0x21a   : > { %v324_v20 = vpop.permute.xlu1 %323 }
 0x21b   : > { %v325_v21 = vadd.f32 %v324_v20, %v322_v18 }
 0x21d   : > { %326 = vrot.lane.b32.xlu1 %v325_v21, %s622_s20 }
 0x28f   : > { %v327_v22 = vpop.permute.xlu1 %326 }
 0x290   : > { %v328_v23 = vadd.f32 %v327_v22, %v325_v21 }
 0x292   : > { %329 = vrot.lane.b32.xlu0 %v328_v23, %s623_s21 }
 0x304   : > { %v330_v24 = vpop.permute.xlu0 %329 }
 0x305   : > { %v331_v25 = vadd.f32 %v330_v24, %v328_v23 }
 0x307   : > { %332 = vrot.lane.b32.xlu1 %v331_v25, %s625_s26 }
 0x379   : > { %v333_v26 = vpop.permute.xlu1 %332 }
 0x37a   : > { %v334_v27 = vadd.f32 %v333_v26, %v331_v25 }
 0x37c   : > { %v335_v29 = vmul.f32 -0.5, %v334_v27 }
 0x37e   : > { %v343_v30 = vadd.f32 %v438_v28, %v335_v29 }
 0x380   : > { %v344_v31 = vmul.f32 1.442695, %v343_v30 }
 0x382   : > { %516 = vpow2.f32 %v344_v31 }
 0x38c   : > { %v517_v32 = vpop.eup %516 }
 0x38d   : > { %347 = vst.msk [vmem:[%s227_s9] sm:$0xff] %vm346_vm4, %v517_v32 }
 0x38e PF: > { %p15_p8 = scmp.ge.s32.totalorder %s695_s25, 4   ;;  %s812_s15 = smov %s606_s16 }
 0x38f   : > { %s813_s16 = smov %s610_s17  ;;  %s814_s17 = smov %s721_s14 }
 0x390   : > { %s815_s18 = smov %s695_s25  ;;  %17 = sbr.rel (!%p15_p8) target bundleno = 4 (0x4), region = 80 }
 0x397   :  { %367 = vsyncpa [#allocation3], 1 }
 0x398   :  { %369 = vsyncpa [#allocation3 + $0x1], 1 }
 0x399   :  { %370 = vsyncpa [#allocation5], 1 }

</bundles_post_ra>
